<compile_context>
chip_gen: v7x
topology: tpu7x:2x2x1
jax: 0.10.0
libtpu: 0.0.40
codegen_flags: <defaults>
</compile_context>

<pallas_src>
import functools

import jax
import jax.numpy as jnp
from jax import lax
from jax.experimental import pallas as pl
from jax.experimental.pallas import tpu as pltpu

H0_REAL = 130   # logical hidden width of fc0
H1_REAL = 75    # logical hidden width of fc1
H0_PAD = 256    # 130 padded (bias-feed channel at column 130)
H1_PAD = 128    # 75 padded (bias-feed channel at column 75)

SUB_K_MAX = 512    # in-kernel upcast sub-tile for w0 (f32 temp <= 512 KiB)
SUB_N_MAX = 2048   # in-kernel upcast sub-tile for w2 (f32 temp <= 1 MiB)


# --------------------------------------------------------------------------
# Small host-side helpers
# --------------------------------------------------------------------------
def _round_up(n, m):
    return ((n + m - 1) // m) * m


def _cdiv(a, b):
    return -(-a // b)


def _choose_tile(h, t_max, quantum=512):
    """Padded total and tile size for a streamed dimension of logical size h.

    Guarantees padded % tile == 0 and tile <= t_max, with at most ~`quantum`
    of zero-padding waste (never degrades to a tiny 128-wide tile for
    unlucky h values)."""
    assert t_max >= 128 and (t_max <= 1024 or t_max % quantum == 0)
    hp = _round_up(h, 128)
    if hp <= 1024 and hp <= t_max:
        return hp, hp                         # single small tile
    hp = _round_up(h, quantum)
    if hp <= t_max:
        return hp, hp                         # single large tile
    n = _cdiv(hp, t_max)
    t = _round_up(_cdiv(hp, n), quantum)
    return n * t, t


def _largest_divisor_tile(t, cap):
    """Largest power-of-two-scaled divisor of t that is <= cap (>= 128)."""
    s = min(cap, t)
    while s > 128 and t % s:
        s //= 2
    return s


def _buf_bytes(shape, itemsize):
    """VMEM bytes of one buffer, honoring (8, 128) sublane/lane padding."""
    rows = _round_up(shape[-2] if len(shape) >= 2 else 1, 8)
    cols = _round_up(shape[-1], 128)
    lead = 1
    for d in shape[:-2]:
        lead *= d
    return lead * rows * cols * itemsize


def _vmem_cap_bytes():
    try:
        return int(pltpu.get_tpu_info().vmem_capacity_bytes)
    except Exception:
        return 64 << 20    # smallest physical VMEM across supported gens


def _spec(shape, index_map, n_steps):
    """BlockSpec with triple buffering for long streamed grids."""
    if n_steps >= 3:
        return pl.BlockSpec(shape, index_map, pipeline_mode=pl.Buffered(3))
    return pl.BlockSpec(shape, index_map)


# --------------------------------------------------------------------------
# Kernels
# --------------------------------------------------------------------------
def _mlp01_kernel(x_ref, w0_ref, b0_ref, w1_ref, a1_ref, acc_ref,
                  *, sub_k, n_sub):
    """Layers 0+1.  One grid step handles one K-tile of layer 0; layer 1 runs
    at the last K step on the small resident operands."""
    k = pl.program_id(0)

    @pl.when(k == 0)
    def _init():
        # Layer-0 bias (with the 1.0 bias-feed column) seeds the accumulator.
        acc_ref[...] = b0_ref[...]

    if n_sub == 1:
        acc_ref[...] += jnp.dot(
            x_ref[...], w0_ref[...].astype(jnp.float32),
            preferred_element_type=jnp.float32)
    else:
        # Upcast bf16 w0 per small sub-tile inside the loop so no (tk, 256)
        # f32 temp is ever materialized.
        def body(s, acc):
            off = pl.multiple_of(s * sub_k, sub_k)
            w_sub = w0_ref[pl.ds(off, sub_k), :].astype(jnp.float32)
            x_sub = x_ref[:, pl.ds(off, sub_k)]
            return acc + jnp.dot(x_sub, w_sub,
                                 preferred_element_type=jnp.float32)

        acc_ref[...] = lax.fori_loop(0, n_sub, body, acc_ref[...])

    @pl.when(k == pl.num_programs(0) - 1)
    def _finalize():
        a0 = jnp.maximum(acc_ref[...], 0.0)                       # (1, 256)
        a1 = jnp.dot(a0, w1_ref[...], preferred_element_type=jnp.float32)
        a1_ref[...] = jnp.maximum(a1, 0.0)                        # (1, 128)


def _mlp2_kernel(a1_ref, w2_ref, o_ref, *, sub_n, n_sub):
    """Layer 2.  One grid step produces one lane-dense (1, tn) output tile
    from one streamed (128, tn) w2 tile."""
    a1 = a1_ref[...]
    if n_sub == 1:
        y = jnp.dot(a1, w2_ref[...].astype(jnp.float32),
                    preferred_element_type=jnp.float32)
        o_ref[...] = jnp.maximum(y, 0.0)
    else:
        def body(s, carry):
            off = pl.multiple_of(s * sub_n, sub_n)
            w_sub = w2_ref[:, pl.ds(off, sub_n)].astype(jnp.float32)
            y = jnp.dot(a1, w_sub, preferred_element_type=jnp.float32)
            o_ref[:, pl.ds(off, sub_n)] = jnp.maximum(y, 0.0)
            return carry

        lax.fori_loop(0, n_sub, body, 0)


# --------------------------------------------------------------------------
# Parameter init / packing
# --------------------------------------------------------------------------
def init_params(h_size, key):
    """nn.Linear-style init; weights stored (in_features, out_features)."""
    def linear(k, fan_in, fan_out):
        kw, kb = jax.random.split(k)
        bound = 1.0 / jnp.sqrt(jnp.float32(fan_in))
        w = jax.random.uniform(kw, (fan_in, fan_out), jnp.float32, -bound, bound)
        b = jax.random.uniform(kb, (fan_out,), jnp.float32, -bound, bound)
        return w, b

    k0, k1, k2 = jax.random.split(key, 3)
    w0, b0 = linear(k0, h_size, H0_REAL)
    w1, b1 = linear(k1, H0_REAL, H1_REAL)
    w2, b2 = linear(k2, H1_REAL, h_size)
    return (w0, b0, w1, b1, w2, b2)


def prepare_params(params, h_size, *, tk_max=16384, tn_max=16384):
    """Pad / pack natural (PyTorch-layout) params into kernel operands."""
    w0, b0, w1, b1, w2, b2 = [jnp.asarray(p, jnp.float32) for p in params]
    hp0, tk = _choose_tile(h_size, tk_max)     # layer-0 contraction axis
    hp2, tn = _choose_tile(h_size, tn_max)     # layer-2 output axis

    # Layer 0: weight (hp0, 256); bias (1, 256) with 1.0 at column H0_REAL
    # (the bias-feed channel consumed by layer 1).
    w0p = jnp.zeros((hp0, H0_PAD), jnp.float32).at[:h_size, :H0_REAL].set(w0)
    b0p = (jnp.zeros((1, H0_PAD), jnp.float32)
           .at[0, :H0_REAL].set(b0)
           .at[0, H0_REAL].set(1.0))

    # Layer 1: weight (256, 128) with b1 folded into the bias-feed row and a
    # 1.0 passthrough into column H1_REAL (bias-feed for layer 2).
    w1p = (jnp.zeros((H0_PAD, H1_PAD), jnp.float32)
           .at[:H0_REAL, :H1_REAL].set(w1)
           .at[H0_REAL, :H1_REAL].set(b1)
           .at[H0_REAL, H1_REAL].set(1.0))

    # Layer 2: weight (128, hp2) with b2 folded into the bias-feed row.
    w2p = (jnp.zeros((H1_PAD, hp2), jnp.float32)
           .at[:H1_REAL, :h_size].set(w2)
           .at[H1_REAL, :h_size].set(b2))

    return dict(
        w0=w0p.astype(jnp.bfloat16),   # h_size-scaling weights in bf16
        b0=b0p,
        w1=w1p,
        w2=w2p.astype(jnp.bfloat16),
        h_size=h_size, hp0=hp0, tk=tk, hp2=hp2, tn=tn)


# --------------------------------------------------------------------------
# Forward pass
# --------------------------------------------------------------------------
def ah_forward(x, packed):
    h_size = packed["h_size"]
    assert x.size == h_size
    shape = x.shape
    hp0, tk = packed["hp0"], packed["tk"]
    hp2, tn = packed["hp2"], packed["tn"]
    n_k, n_n = hp0 // tk, hp2 // tn

    sub_k = _largest_divisor_tile(tk, SUB_K_MAX)
    n_sub_k = tk // sub_k
    sub_n = _largest_divisor_tile(tn, SUB_N_MAX)
    n_sub_n = tn // sub_n

    xf = x.reshape(1, h_size).astype(jnp.float32)
    if hp0 != h_size:
        xf = jnp.pad(xf, ((0, 0), (0, hp0 - h_size)))

    vmem_cap = _vmem_cap_bytes() - (2 << 20)   # leave headroom below physical

    # ---------------- call 1: layers 0 + 1 (K-streaming over hp0) ----------
    bufs_k = 3 if n_k >= 3 else 2
    vmem1 = (bufs_k * (_buf_bytes((1, tk), 4)            # x tiles (8-row pad)
                       + tk * H0_PAD * 2)                  # w0 tiles (bf16)
             + 2 * (_buf_bytes((1, H0_PAD), 4)             # b0 (tiny, resident)
                    + H0_PAD * H1_PAD * 4                  # w1 (tiny, resident)
                    + _buf_bytes((1, H1_PAD), 4))          # a1 output
             + _buf_bytes((1, H0_PAD), 4)                  # acc scratch
             + sub_k * H0_PAD * 4                          # in-kernel f32 temp
             + (2 << 20))                                  # headroom
    vmem1 = int(min(max(vmem1, 16 << 20), vmem_cap))

    kernel1 = functools.partial(_mlp01_kernel, sub_k=sub_k, n_sub=n_sub_k)
    a1 = pl.pallas_call(
        kernel1,
        out_shape=jax.ShapeDtypeStruct((1, H1_PAD), jnp.float32),
        grid_spec=pltpu.PrefetchScalarGridSpec(
            num_scalar_prefetch=0,
            grid=(n_k,),
            in_specs=[
                _spec((1, tk), lambda k: (0, k), n_k),            # x  (K-tiled)
                _spec((tk, H0_PAD), lambda k: (k, 0), n_k),       # w0 (K-tiled)
                pl.BlockSpec((1, H0_PAD), lambda k: (0, 0)),      # b0 (+feed)
                pl.BlockSpec((H0_PAD, H1_PAD), lambda k: (0, 0)), # w1 (+b1)
            ],
            out_specs=pl.BlockSpec((1, H1_PAD), lambda k: (0, 0)),
            scratch_shapes=[pltpu.VMEM((1, H0_PAD), jnp.float32)],
        ),
        compiler_params=pltpu.CompilerParams(
            dimension_semantics=("arbitrary",),    # K is a reduction axis
            vmem_limit_bytes=vmem1,
        ),
    )(xf, packed["w0"], packed["b0"], packed["w1"])

    # ---------------- call 2: layer 2 (N-streaming over hp2) ---------------
    bufs_n = 3 if n_n >= 3 else 2
    vmem2 = (2 * _buf_bytes((1, H1_PAD), 4)                # a1 (tiny, resident)
             + bufs_n * H1_PAD * tn * 2                    # w2 tiles (bf16)
             + 2 * _buf_bytes((1, tn), 4)                  # output tiles
             + H1_PAD * sub_n * 4                          # in-kernel f32 temp
             + (2 << 20))
    vmem2 = int(min(max(vmem2, 16 << 20), vmem_cap))

    kernel2 = functools.partial(_mlp2_kernel, sub_n=sub_n, n_sub=n_sub_n)
    out = pl.pallas_call(
        kernel2,
        out_shape=jax.ShapeDtypeStruct((1, hp2), jnp.float32),
        grid_spec=pltpu.PrefetchScalarGridSpec(
            num_scalar_prefetch=0,
            grid=(n_n,),
            in_specs=[
                pl.BlockSpec((1, H1_PAD), lambda n: (0, 0)),      # a1 (+feed)
                _spec((H1_PAD, tn), lambda n: (0, n), n_n),       # w2 (N-tiled)
            ],
            out_specs=pl.BlockSpec((1, tn), lambda n: (0, n)),    # lane-dense
        ),
        compiler_params=pltpu.CompilerParams(
            dimension_semantics=("parallel",),     # independent output tiles
            vmem_limit_bytes=vmem2,
        ),
    )(a1, packed["w2"])

    out_row = out[0]
    if hp2 != h_size:
        out_row = out_row[:h_size]
    return out_row.reshape(shape)


# --------------------------------------------------------------------------
# Pure-JAX reference (same bf16 storage of w0 / w2 / b2 as the kernel)
# --------------------------------------------------------------------------
def ah_reference(x, params):
    w0, b0, w1, b1, w2, b2 = params
    q = lambda a: a.astype(jnp.bfloat16).astype(jnp.float32)
    hi = jax.lax.Precision.HIGHEST
    v = x.reshape(1, -1).astype(jnp.float32)
    v = jnp.maximum(jnp.dot(v, q(w0), precision=hi) + b0, 0.0)
    v = jnp.maximum(jnp.dot(v, w1, precision=hi) + b1, 0.0)
    v = jnp.maximum(jnp.dot(v, q(w2), precision=hi) + q(b2), 0.0)
    return v.reshape(x.shape)


if __name__ == "__main__":
    key = jax.random.PRNGKey(0)
    k_x, k_x2, k_p, k_p2 = jax.random.split(key, 4)

    # Test 1: H with l=8, f=16 -> h_size = 128 (single-tile fast path).
    x = jax.random.normal(k_x, (8, 16), dtype=jnp.float32)
    params = init_params(x.size, k_p)
    packed = prepare_params(params, x.size)
    out = jax.block_until_ready(ah_forward(x, packed))
    ref = ah_reference(x, params)
    assert out.shape == x.shape
    err = float(jnp.max(jnp.abs(out - ref)))
    assert jnp.allclose(out, ref, atol=2e-4, rtol=2e-4), f"test1 err={err}"

    # Test 2: non-128-multiple h_size = 2112 -> exercises zero-padding and the
    # in-kernel sub-tiled bf16->f32 upcast loops (single grid step).
    x2 = jax.random.normal(k_x2, (33, 64), dtype=jnp.float32)
    params2 = init_params(x2.size, k_p2)
    packed2 = prepare_params(params2, x2.size)
    out2 = jax.block_until_ready(ah_forward(x2, packed2))
    ref2 = ah_reference(x2, params2)
    assert out2.shape == x2.shape
    err2 = float(jnp.max(jnp.abs(out2 - ref2)))
    assert jnp.allclose(out2, ref2, atol=2e-4, rtol=2e-4), f"test2 err={err2}"

    # Test 3: same data but with tiny tile caps -> exercises the multi-step
    # streamed grids (K reduction with pl.when init/finalize, parallel N axis)
    # and the pl.Buffered(3) triple-buffered streaming path.
    packed3 = prepare_params(params2, x2.size, tk_max=512, tn_max=512)
    out3 = jax.block_until_ready(ah_forward(x2, packed3))
    assert out3.shape == x2.shape
    err3 = float(jnp.max(jnp.abs(out3 - ref2)))
    assert jnp.allclose(out3, ref2, atol=2e-4, rtol=2e-4), f"test3 err={err3}"

    print("KERNEL_OK")
</pallas_src>

<mosaic_0001>
module attributes {stable_mosaic.version = 11 : i64} {
  func.func @_mlp01_kernel(%arg0: i32, %arg1: memref<1x128xf32, #tpu.memory_space<vmem>>, %arg2: memref<128x256xbf16, #tpu.memory_space<vmem>>, %arg3: memref<1x256xf32, #tpu.memory_space<vmem>>, %arg4: memref<256x128xf32, #tpu.memory_space<vmem>>, %arg5: memref<1x128xf32, #tpu.memory_space<vmem>>, %arg6: memref<1x256xf32, #tpu.memory_space<vmem>>) attributes {dimension_semantics = [#tpu.dimension_semantics<arbitrary>], iteration_bounds = array<i64: 1>, scalar_prefetch = 0 : i64, scratch_operands = 1 : i64, tpu.core_type = #tpu.core_type<tc>, window_params = [{transform_indices = @transform_0, window_bounds = array<i64: 1, 128>}, {transform_indices = @transform_1, window_bounds = array<i64: 128, 256>}, {pipeline_mode = #tpu.pipeline_mode<synchronous>, transform_indices = @transform_2, window_bounds = array<i64: 1, 256>}, {pipeline_mode = #tpu.pipeline_mode<synchronous>, transform_indices = @transform_3, window_bounds = array<i64: 256, 128>}, {pipeline_mode = #tpu.pipeline_mode<synchronous>, transform_indices = @transform_4, window_bounds = array<i64: 1, 128>}]} {
    %c0_i32 = arith.constant 0 : i32
    %0 = arith.cmpi eq, %arg0, %c0_i32 : i32
    %1 = arith.extui %0 : i1 to i32
    %c0_i32_0 = arith.constant 0 : i32
    %2 = arith.cmpi ne, %1, %c0_i32_0 : i32
    scf.if %2 {
      %c0_10 = arith.constant 0 : index
      %c0_11 = arith.constant 0 : index
      %13 = vector.load %arg3[%c0_10, %c0_11] : memref<1x256xf32, #tpu.memory_space<vmem>>, vector<1x256xf32>
      %c0_12 = arith.constant 0 : index
      %c0_13 = arith.constant 0 : index
      %14 = vector.load %arg6[%c0_12, %c0_13] : memref<1x256xf32, #tpu.memory_space<vmem>>, vector<1x256xf32>
      tpu.vector_store %arg6[%c0_12, %c0_13], %13 {strides = array<i32>} : memref<1x256xf32, #tpu.memory_space<vmem>>, vector<1x256xf32>,
    } else {
    }
    %c0 = arith.constant 0 : index
    %c0_1 = arith.constant 0 : index
    %3 = vector.load %arg6[%c0, %c0_1] : memref<1x256xf32, #tpu.memory_space<vmem>>, vector<1x256xf32>
    %c0_2 = arith.constant 0 : index
    %c0_3 = arith.constant 0 : index
    %4 = vector.load %arg1[%c0_2, %c0_3] : memref<1x128xf32, #tpu.memory_space<vmem>>, vector<1x128xf32>
    %c0_4 = arith.constant 0 : index
    %c0_5 = arith.constant 0 : index
    %5 = vector.load %arg2[%c0_4, %c0_5] : memref<128x256xbf16, #tpu.memory_space<vmem>>, vector<128x256xbf16>
    %6 = arith.extf %5 : vector<128x256xbf16> to vector<128x256xf32>
    %cst = arith.constant dense<0.000000e+00> : vector<1x256xf32>
    %7 = tpu.matmul %4, %6, %cst {dimension_numbers = #tpu.dot_dimension_numbers<[1], [0], [0], [1], [0, 0, 1, 1], [], []>} : vector<1x128xf32>, vector<128x256xf32>, vector<1x256xf32> -> vector<1x256xf32>
    %8 = arith.addf %3, %7 : vector<1x256xf32>
    %c0_6 = arith.constant 0 : index
    %c0_7 = arith.constant 0 : index
    %9 = vector.load %arg6[%c0_6, %c0_7] : memref<1x256xf32, #tpu.memory_space<vmem>>, vector<1x256xf32>
    tpu.vector_store %arg6[%c0_6, %c0_7], %8 {strides = array<i32>} : memref<1x256xf32, #tpu.memory_space<vmem>>, vector<1x256xf32>,
    %c0_i32_8 = arith.constant 0 : i32
    %10 = arith.cmpi eq, %arg0, %c0_i32_8 : i32
    %11 = arith.extui %10 : i1 to i32
    %c0_i32_9 = arith.constant 0 : i32
    %12 = arith.cmpi ne, %11, %c0_i32_9 : i32
    scf.if %12 {
      %c0_10 = arith.constant 0 : index
      %c0_11 = arith.constant 0 : index
      %13 = vector.load %arg6[%c0_10, %c0_11] : memref<1x256xf32, #tpu.memory_space<vmem>>, vector<1x256xf32>
      %cst_12 = arith.constant 0.000000e+00 : f32
      %14 = vector.broadcast %cst_12 : f32 to vector<1x256xf32>
      %15 = arith.maximumf %13, %14 : vector<1x256xf32>
      %c0_13 = arith.constant 0 : index
      %c0_14 = arith.constant 0 : index
      %16 = vector.load %arg4[%c0_13, %c0_14] : memref<256x128xf32, #tpu.memory_space<vmem>>, vector<256x128xf32>
      %cst_15 = arith.constant dense<0.000000e+00> : vector<1x128xf32>
      %17 = tpu.matmul %15, %16, %cst_15 {dimension_numbers = #tpu.dot_dimension_numbers<[1], [0], [0], [1], [0, 0, 1, 1], [], []>} : vector<1x256xf32>, vector<256x128xf32>, vector<1x128xf32> -> vector<1x128xf32>
      %cst_16 = arith.constant 0.000000e+00 : f32
      %18 = vector.broadcast %cst_16 : f32 to vector<1x128xf32>
      %19 = arith.maximumf %17, %18 : vector<1x128xf32>
      %c0_17 = arith.constant 0 : index
      %c0_18 = arith.constant 0 : index
      %20 = vector.load %arg5[%c0_17, %c0_18] : memref<1x128xf32, #tpu.memory_space<vmem>>, vector<1x128xf32>
      tpu.vector_store %arg5[%c0_17, %c0_18], %19 {strides = array<i32>} : memref<1x128xf32, #tpu.memory_space<vmem>>, vector<1x128xf32>,
    } else {
    }
    return
  }
  func.func @transform_0(%arg0: i32) -> (i32, i32) {
    %c0_i32 = arith.constant 0 : i32
    %c0_i32_0 = arith.constant 0 : i32
    return %c0_i32, %arg0 : i32, i32
  }
  func.func @transform_1(%arg0: i32) -> (i32, i32) {
    %c0_i32 = arith.constant 0 : i32
    %c0_i32_0 = arith.constant 0 : i32
    return %arg0, %c0_i32 : i32, i32
  }
  func.func @transform_2(%arg0: i32) -> (i32, i32) {
    %c0_i32 = arith.constant 0 : i32
    %c0_i32_0 = arith.constant 0 : i32
    %c0_i32_1 = arith.constant 0 : i32
    return %c0_i32, %c0_i32_0 : i32, i32
  }
  func.func @transform_3(%arg0: i32) -> (i32, i32) {
    %c0_i32 = arith.constant 0 : i32
    %c0_i32_0 = arith.constant 0 : i32
    %c0_i32_1 = arith.constant 0 : i32
    return %c0_i32, %c0_i32_0 : i32, i32
  }
  func.func @transform_4(%arg0: i32) -> (i32, i32) {
    %c0_i32 = arith.constant 0 : i32
    %c0_i32_0 = arith.constant 0 : i32
    %c0_i32_1 = arith.constant 0 : i32
    return %c0_i32, %c0_i32_0 : i32, i32
  }
}

</mosaic_0001>

<bundles_post_ra>
// kernel: tpu_custom_call.1
= control target key start
LH: loop header
LB: loop body
LE: loop exit
PB: predicated region body
PF: predicated region fallthrough
CT: control target
= control target key end

     0   :  { %9 = vsyncpa [#allocation4], 0  ;;  %s687_s0 = inlined_call_operand.hbm [shape: f32[1,128], index: 0, kind: input, shape index: {}]   ;;  %s688_s1 = inlined_call_operand.hbm [shape: bf16[128,256], index: 1, kind: input, shape index: {}]   ;;  %s689_s2 = inlined_call_operand.vmem [shape: f32[1,256], index: 2, kind: input, shape index: {}]   ;;  %s690_s3 = inlined_call_operand.hbm [shape: f32[256,128], index: 3, kind: input, shape index: {}]   ;;  %s691_s4 = inlined_call_operand.hbm [shape: f32[1,128], index: 4, kind: output, shape index: {}]  }
   0x1   :  { %10 = vsyncpa [#allocation7], 0 }
   0x2   :  { %11 = vsyncpa [#allocation5], 0  ;;  %s589_s15 = smov [#allocation6]   ;;  %s495_s19 = scalar_lea.hbm %s688_s1, 2048 }
   0x3   :  { %s27_s16 = sshll.u32 %s589_s15, 4  ;;  %p496_p0 = scmp.ne.s32.totalorder %s688_s1, %s495_s19  ;;  %s28_s16 = int_to_ptr.vmem [resolvable:$true] %s27_s16 }
   0x4   :  { %p499_p1 = scmp.lt.u32.totalorder %s495_s19, %s688_s1 }
   0x6   :  { %p501_p2 = pnand %p499_p1, %p496_p0 }
   0x8   :  { %504 = shalt.err (!%p501_p2)
}
   0x9   :  { %s505_s24 = scalar_lea.vmem %s28_s16, 2048  ;;  %p510_p4 = scmp.lt.s32.totalorder %s28_s16, %s28_s16 }
   0xa   :  { %p506_p3 = scmp.ne.s32.totalorder %s28_s16, %s505_s24  ;;  %p511_p5 = scmp.lt.s32.totalorder %s505_s24, %s505_s24 }
   0xc   :  { %p512_p6 = por %p511_p5, %p510_p4 }
   0xe   :  { %p513_p7 = pnand %p512_p6, %p506_p3 }
  0x10   :  { %516 = shalt.err (!%p513_p7)
}
  0x11   :  { %s590_s25 = smov 128   ;;  %s591_s26 = smov 8  }
  0x12   :  { %33 = dma.hbm_to_vmem [thread:$0]  %s688_s1, 2048, %s28_s16, [#allocation7], %s590_s25, %s590_s25, %s591_s26  }
  0x13   :  { %s592_s29 = smov [#allocation3]   ;;  %s593_s5 = smov [#allocation8]  }
  0x14   :  { %s18_s30 = sshll.u32 %s592_s29, 4  ;;  %s41_s6 = sshll.u32 %s593_s5, 4  ;;  %s19_s30 = int_to_ptr.vmem [resolvable:$true] %s18_s30  ;;  %s42_s6 = int_to_ptr.vmem [resolvable:$true] %s41_s6 }
  0x15   :  { %s517_s9 = scalar_lea.hbm %s687_s0, 16 }
  0x16   :  { %p518_p8 = scmp.ne.s32.totalorder %s687_s0, %s517_s9  ;;  %p521_p9 = scmp.lt.u32.totalorder %s517_s9, %s687_s0 }
  0x18   :  { %p523_p10 = pnand %p521_p9, %p518_p8 }
  0x1a   :  { %526 = shalt.err (!%p523_p10)
}
  0x1b   :  { %s527_s1 = scalar_lea.vmem %s19_s30, 16  ;;  %s531_s14 = scalar_lea.vmem %s19_s30, 32 }
  0x1c   :  { %p528_p11 = scmp.ne.s32.totalorder %s19_s30, %s527_s1  ;;  %p532_p12 = scmp.lt.s32.totalorder %s19_s30, %s19_s30 }
  0x1d   :  { %p533_p13 = scmp.lt.s32.totalorder %s531_s14, %s527_s1 }
  0x1f   :  { %p534_p0 = por %p533_p13, %p532_p12 }
  0x21   :  { %p535_p1 = pnand %p534_p0, %p528_p11 }
  0x23   :  { %538 = shalt.err (!%p535_p1)
}
  0x24   :  { %21 = dma.hbm_to_vmem [thread:$0]  %s687_s0, 16, %s19_s30, [#allocation4]  }
  0x25   :  { %s539_s19 = scalar_lea.hbm %s690_s3, 4096 }
  0x26   :  { %p540_p2 = scmp.ne.s32.totalorder %s690_s3, %s539_s19  ;;  %p543_p3 = scmp.lt.u32.totalorder %s539_s19, %s690_s3 }
  0x28   :  { %p545_p4 = pnand %p543_p3, %p540_p2 }
  0x2a   :  { %548 = shalt.err (!%p545_p4)
}
  0x2b   :  { %s549_s24 = scalar_lea.vmem %s42_s6, 4096  ;;  %p554_p6 = scmp.lt.s32.totalorder %s42_s6, %s42_s6 }
  0x2c   :  { %p550_p5 = scmp.ne.s32.totalorder %s42_s6, %s549_s24  ;;  %p555_p7 = scmp.lt.s32.totalorder %s549_s24, %s549_s24 }
  0x2e   :  { %p556_p8 = por %p555_p7, %p554_p6 }
  0x30   :  { %p557_p9 = pnand %p556_p8, %p550_p5 }
  0x32   :  { %560 = shalt.err (!%p557_p9)
}
  0x33   :  { %47 = dma.hbm_to_vmem [thread:$0]  %s690_s3, 4096, %s42_s6, [#allocation7], %s590_s25, %s590_s25, %s591_s26  }
  0x34   :  { %583 = dma.done.wait [#allocation4], 16  }
  0x35   :  { %584 = vsyncadd [#allocation4], 4294967280 }
  0x36   :  { %585 = dma.done.wait [#allocation7], 6144  }
  0x37   :  { %586 = vsyncadd [#allocation7], 4294961152  ;;  %v594_v0 = vmov 0.0   ;;  %v471_v1 = vld [vmem:[#allocation6 + $0x4] ss:$8 sps:$4 sm:$0xff]   ;;  %v235_v15 = vld [vmem:[#allocation8 + $0x90] sm:$0xff]  ;;  %v62_v35 = vlaneseq }
  0x38   :  { %181 = vmatprep.mubr.f32.mxu0 %v594_v0  ;;  %v473_v2 = vld [vmem:[#allocation6] ss:$8 sps:$4 sm:$0xff]   ;;  %384 = vmatprep.subr.bf16.mxu0 %v471_v1  ;;  %v474_v3 = vld [vmem:[#allocation6 + $0x14] ss:$8 sps:$4 sm:$0xff]   ;;  %v476_v4 = vld [vmem:[#allocation6 + $0x10] ss:$8 sps:$4 sm:$0xff]  }
  0x39   :  { %386 = vmatpush1.bf16.msra.mxu0 %v473_v2  ;;  %v477_v5 = vld [vmem:[#allocation6 + $0x24] ss:$8 sps:$4 sm:$0xff]   ;;  %v479_v6 = vld [vmem:[#allocation6 + $0x20] ss:$8 sps:$4 sm:$0xff]   ;;  %v480_v7 = vld [vmem:[#allocation6 + $0x34] ss:$8 sps:$4 sm:$0xff]  }
  0x3a   :  { %388 = vmatprep.subr.bf16.mxu0 %v474_v3  ;;  %v482_v8 = vld [vmem:[#allocation6 + $0x30] ss:$8 sps:$4 sm:$0xff]   ;;  %v483_v9 = vld [vmem:[#allocation6 + $0x44] ss:$8 sps:$4 sm:$0xff]   ;;  %v485_v23 = vld [vmem:[#allocation6 + $0x40] ss:$8 sps:$4 sm:$0xff]  }
  0x3b   :  { %v233_v10 = vld [vmem:[#allocation8 + $0x80] sm:$0xff]  ;;  %v234_v11 = vld [vmem:[#allocation8 + $0x88] sm:$0xff]  ;;  %v236_v16 = vld [vmem:[#allocation8 + $0x98] sm:$0xff]  ;;  %vm667_vm0 = vcmp.lt.s32.totalorder %v62_v35, 256 }
  0x3c   :  { %v217_v12 = vld [vmem:[#allocation8] sm:$0xff]  ;;  %v415_v13 = vpack.c.bf16 %v234_v11, %v233_v10  ;;  %v218_v14 = vld [vmem:[#allocation8 + $0x8] sm:$0xff]  ;;  %v419_v18 = vpack.c.bf16 %v236_v16, %v235_v15  ;;  %v219_v19 = vld [vmem:[#allocation8 + $0x10] sm:$0xff] }
  0x3d   :  { %390 = vmatpush1.bf16.msra.mxu0 %v476_v4  ;;  %v417_v17 = vpack.c.bf16 %v218_v14, %v217_v12  ;;  %v220_v20 = vld [vmem:[#allocation8 + $0x18] sm:$0xff]  ;;  %v237_v21 = vld [vmem:[#allocation8 + $0xa0] sm:$0xff]  ;;  %v238_v22 = vld [vmem:[#allocation8 + $0xa8] sm:$0xff] }
  0x3e   :  { %392 = vmatprep.subr.bf16.mxu0 %v477_v5  ;;  %416 = vmatprep.subr.bf16.mxu1 %v415_v13  ;;  %v421_v24 = vpack.c.bf16 %v220_v20, %v219_v19  ;;  %v486_v25 = vld [vmem:[#allocation6 + $0x54] ss:$8 sps:$4 sm:$0xff]   ;;  %v423_v26 = vpack.c.bf16 %v238_v22, %v237_v21  ;;  %v488_v27 = vld [vmem:[#allocation6 + $0x50] ss:$8 sps:$4 sm:$0xff]   ;;  %v489_v28 = vld [vmem:[#allocation6 + $0x64] ss:$8 sps:$4 sm:$0xff]  }
  0x3f   :  { %418 = vmatpush3.bf16.msra.mxu1 %v417_v17  ;;  %v491_v29 = vld [vmem:[#allocation6 + $0x60] ss:$8 sps:$4 sm:$0xff]   ;;  %v492_v30 = vld [vmem:[#allocation6 + $0x74] ss:$8 sps:$4 sm:$0xff]   ;;  %v494_v31 = vld [vmem:[#allocation6 + $0x70] ss:$8 sps:$4 sm:$0xff]  }
  0x40   :  { %420 = vmatprep.subr.bf16.mxu1 %v419_v18  ;;  %v68_v32 = vld [vmem:[#allocation3] sm:$0x1]  ;;  %v221_v33 = vld [vmem:[#allocation8 + $0x20] sm:$0xff]  ;;  %v222_v34 = vld [vmem:[#allocation8 + $0x28] sm:$0xff]  ;;  %v595_v5 = vmov 1966171168  }
  0x41   :  { %394 = vmatpush1.bf16.msra.mxu0 %v479_v6  ;;  %v425_v36 = vpack.c.bf16 %v222_v34, %v221_v33  ;;  %v61_v37 = vld [vmem:[%s689_s2] sm:$0x3]  ;;  %v240_v40 = vld [vmem:[#allocation8 + $0xb8] sm:$0xff]  ;;  %v241_v45 = vld [vmem:[#allocation8 + $0xc0] sm:$0xff]  ;;  %v192_v6 = vunpack.c.l.s4 %v595_v5  ;;  %s596_s2 = smov [#allocation9]  }
  0x42   :  { %396 = vmatprep.subr.bf16.mxu0 %v480_v7  ;;  %66 = vst.msk [vmem:[#allocation2] sm:$0x3] %vm667_vm0, %v61_v37  ;;  %v239_v39 = vld [vmem:[#allocation8 + $0xb0] sm:$0xff]  ;;  %v224_v43 = vld [vmem:[#allocation8 + $0x38] sm:$0xff]  ;;  %v242_v46 = vld [vmem:[#allocation8 + $0xc8] sm:$0xff]  ;;  %s338_s26 = sshll.u32 %s596_s2, 4  ;;  %s339_s26 = int_to_ptr.vmem [resolvable:$true] %s338_s26 }
  0x43   :  { %422 = vmatpush3.bf16.msra.mxu1 %v421_v24  ;;  %v427_v41 = vpack.c.bf16 %v240_v40, %v239_v39  ;;  %v223_v42 = vld [vmem:[#allocation8 + $0x30] sm:$0xff]  ;;  %v431_v47 = vpack.c.bf16 %v242_v46, %v241_v45  ;;  %v225_v48 = vld [vmem:[#allocation8 + $0x40] sm:$0xff]  ;;  %v226_v49 = vld [vmem:[#allocation8 + $0x48] sm:$0xff]  ;;  %v193_v7 = vunpack.c.0.s8 %v192_v6  ;;  %s561_s28 = scalar_lea.vmem %s339_s26, 16  ;;  %s565_s29 = scalar_lea.vmem %s339_s26, 32 }
  0x44   :  { %424 = vmatprep.subr.bf16.mxu1 %v423_v26  ;;  %v429_v44 = vpack.c.bf16 %v224_v43, %v223_v42  ;;  %v433_v50 = vpack.c.bf16 %v226_v49, %v225_v48  ;;  %v243_v51 = vld [vmem:[#allocation8 + $0xd0] sm:$0xff]  ;;  %v244_v52 = vld [vmem:[#allocation8 + $0xd8] sm:$0xff]  ;;  %v245_v57 = vld [vmem:[#allocation8 + $0xe0] sm:$0xff]  ;;  %p562_p10 = scmp.ne.s32.totalorder %s339_s26, %s561_s28  ;;  %p566_p11 = scmp.lt.s32.totalorder %s339_s26, %s339_s26 }
  0x45   :  { %398 = vmatpush1.bf16.msra.mxu0 %v482_v8  ;;  %v435_v53 = vpack.c.bf16 %v244_v52, %v243_v51  ;;  %v227_v54 = vld [vmem:[#allocation8 + $0x50] sm:$0xff]  ;;  %v228_v55 = vld [vmem:[#allocation8 + $0x58] sm:$0xff]  ;;  %v246_v58 = vld [vmem:[#allocation8 + $0xe8] sm:$0xff]  ;;  %v195_v8 = vshrl.u32 %v62_v35, 7  ;;  %p567_p12 = scmp.lt.s32.totalorder %s565_s29, %s561_s28 }
  0x46   :  { %400 = vmatprep.subr.bf16.mxu0 %v483_v9  ;;  %v437_v56 = vpack.c.bf16 %v228_v55, %v227_v54  ;;  %v229_v59 = vld [vmem:[#allocation8 + $0x60] sm:$0xff]  ;;  %v439_v60 = vpack.c.bf16 %v246_v58, %v245_v57  ;;  %v230_v61 = vld [vmem:[#allocation8 + $0x68] sm:$0xff]  ;;  %v247_v62 = vld [vmem:[#allocation8 + $0xf0] sm:$0xff] }
  0x47   :  { %426 = vmatpush3.bf16.msra.mxu1 %v425_v36  ;;  %v248_v63 = vld [vmem:[#allocation8 + $0xf8] sm:$0xff]  ;;  %v441_v0 = vpack.c.bf16 %v230_v61, %v229_v59  ;;  %v231_v2 = vld [vmem:[#allocation8 + $0x70] sm:$0xff]  ;;  %v196_v10 = vsub.s32 %v193_v7, %v195_v8  ;;  %v256_v17 = vsub.s32 1, %v195_v8  ;;  %v252_v18 = vsub.s32 0, %v195_v8  ;;  %p568_p13 = por %p567_p12, %p566_p11 }
  0x48   :  { %428 = vmatprep.subr.bf16.mxu1 %v427_v41  ;;  %v443_v1 = vpack.c.bf16 %v248_v63, %v247_v62  ;;  %v232_v3 = vld [vmem:[#allocation8 + $0x78] sm:$0xff] }
  0x49   :  { %402 = vmatpush1.bf16.msra.mxu0 %v485_v23  ;;  %v445_v4 = vpack.c.bf16 %v232_v3, %v231_v2  ;;  %v67_v14 = vld [vmem:[#allocation2] sm:$0x3]  ;;  %p569_p0 = pnand %p568_p13, %p562_p10 }
  0x4a   :  { %404 = vmatprep.subr.bf16.mxu0 %v486_v25 }
  0x4b   :  { %430 = vmatpush3.bf16.msra.mxu1 %v429_v44 }
  0x4c   :  { %432 = vmatprep.subr.bf16.mxu1 %v431_v47 }
  0x4d   :  { %406 = vmatpush1.bf16.msra.mxu0 %v488_v27 }
  0x4e   :  { %408 = vmatprep.subr.bf16.mxu0 %v489_v28 }
  0x4f   :  { %434 = vmatpush3.bf16.msra.mxu1 %v433_v50 }
  0x50   :  { %436 = vmatprep.subr.bf16.mxu1 %v435_v53 }
  0x51   :  { %410 = vmatpush1.bf16.msra.mxu0 %v491_v29 }
  0x52   :  { %412 = vmatprep.subr.bf16.mxu0 %v492_v30 }
  0x53   :  { %438 = vmatpush3.bf16.msra.mxu1 %v437_v56 }
  0x54   :  { %440 = vmatprep.subr.bf16.mxu1 %v439_v60 }
  0x55   :  { %414 = vmatpush1.bf16.msra.mxu0 %v494_v31 }
  0x57   :  { %442 = vmatpush3.bf16.msra.mxu1 %v441_v0 }
  0x58   :  { %182 = vmatmul.mubr.f32.vlgmr.msra.gmra.mrb[0].mxu0 %v68_v32  ;;  %444 = vmatprep.subr.bf16.mxu1 %v443_v1 }
  0x5b   :  { %446 = vmatpush3.bf16.msra.mxu1 %v445_v4 }
 0x12b   :  { %v183_v9 = vpop.f32.mrb[0].mxu0 }
 0x12c   :  { %v185_v11 = vpop.f32.mrb[1].mxu0 }
 0x12d   :  { %v190_v12 = vcombine.low %v183_v9, %v185_v11 }
 0x12f   :  { %v197_v13 = vrot.slane %v190_v12, %v196_v10 }
 0x131   :  { %v204_v15 = vrot.slane %v197_v13, %v196_v10 }
 0x133   :  { %v206_v16 = vadd.f32 %v204_v15, %v67_v14 }
 0x135   :  { %211 = vst.msk [vmem:[#allocation2] sm:$0x3] %vm667_vm0, %v206_v16 }
 0x13c   :  { %v215_v19 = vld [vmem:[#allocation2] sm:$0x3] }
 0x13d   :  { %v216_v20 = vmax.f32 %v215_v19, 0.0 }
 0x13f   :  { %v257_v21 = vrot.slane %v216_v20, %v256_v17  ;;  %v253_v22 = vrot.slane %v216_v20, %v252_v18 }
 0x141   :  { %324 = vmatprep.mubr.f32.mxu1 %v257_v21 }
 0x142   :  { %325 = vmatmul.mubr.f32.vlgmr.msra.gmra.mrb[0].mxu1 %v253_v22 }
 0x215   :  { %v380_v23 = vpop.f32.mrb[0].mxu1 }
 0x216   :  { %v381_v24 = vpop.f32.mrb[1].mxu1 }
 0x217   :  { %v382_v25 = vadd.f32 %v381_v24, %v380_v23 }
 0x219   :  { %v330_v26 = vmax.f32 %v382_v25, 0.0 }
 0x21b   :  { %331 = vst [vmem:[#allocation9] sm:$0x1] %v330_v26 }
 0x21c   :  { %572 = shalt.err (!%p569_p0)
}
 0x21d   :  { %s573_s6 = scalar_lea.hbm %s691_s4, 16 }
 0x21e   :  { %p574_p1 = scmp.ne.s32.totalorder %s691_s4, %s573_s6  ;;  %p577_p2 = scmp.lt.u32.totalorder %s573_s6, %s691_s4 }
 0x220   :  { %p579_p3 = pnand %p577_p2, %p574_p1 }
 0x222   :  { %582 = shalt.err (!%p579_p3)
}
 0x223   :  { %341 = dma.vmem_to_hbm [thread:$0]  %s339_s26, 16, %s691_s4, [#allocation5]  }
 0x224   :  { %587 = dma.done.wait [#allocation5], 16  }
 0x225   :  { %588 = vsyncadd [#allocation5], 4294967280 }
 0x226   :  { %345 = vsyncpa [#allocation4], 1 }
 0x227   :  { %346 = vsyncpa [#allocation7], 1 }
 0x228   :  { %347 = vsyncpa [#allocation5], 1 }

</bundles_post_ra>
